<compile_context>
chip_gen: v5e
topology: v5e:2x2
jax: 0.10.0
libtpu: 0.0.40
codegen_flags: <defaults>
</compile_context>

<pallas_src>
import jax
import jax.numpy as jnp
from jax.experimental import pallas as pl
from jax.experimental.pallas import tpu as pltpu


def _scaler_kernel(offset_ref, scale_ref, x_ref, o_ref):
    # (tm, tf) tile of x; (1, tf) offset/scale broadcast over rows.
    o_ref[...] = ((x_ref[...] - offset_ref[...]) * scale_ref[...]).astype(o_ref.dtype)


def _pick_tile(dim, target, quantum):
    """Largest legal tile <= target: the full dim, or a multiple of `quantum`."""
    if dim <= target:
        return dim  # full-extent block is always legal, even if not quantum-aligned
    return max(quantum, (target // quantum) * quantum)


def scaler_forward(x, offset, scale, *, tm=512, tf=1024):
    """(x - offset) * scale with offset/scale of shape (1, F), x of shape (N, F)."""
    N, F = x.shape
    tm = _pick_tile(N, tm, 8)     # sublane quantum
    tf = _pick_tile(F, tf, 128)   # lane quantum (keeps stores unmasked / lane-dense)

    grid = (pl.cdiv(N, tm), pl.cdiv(F, tf))

    itemsize = jnp.dtype(x.dtype).itemsize
    cost = pl.CostEstimate(
        flops=2 * N * F,
        transcendentals=0,
        bytes_accessed=2 * N * F * itemsize + 2 * F * itemsize,
    )

    return pl.pallas_call(
        _scaler_kernel,
        out_shape=jax.ShapeDtypeStruct((N, F), x.dtype),
        grid_spec=pltpu.PrefetchScalarGridSpec(
            num_scalar_prefetch=0,
            grid=grid,
            in_specs=[
                pl.BlockSpec((1, tf), lambda i, j: (0, j)),    # offset (per feature-tile)
                pl.BlockSpec((1, tf), lambda i, j: (0, j)),    # scale  (per feature-tile)
                pl.BlockSpec((tm, tf), lambda i, j: (i, j)),   # x tile
            ],
            out_specs=pl.BlockSpec((tm, tf), lambda i, j: (i, j)),
        ),
        compiler_params=pltpu.CompilerParams(
            # Both axes independent -> megacore (v7x) splits the grid across TCs.
            dimension_semantics=("parallel", "parallel"),
            # Double-buffered x + out tiles (~2 MiB each) + tiny offset/scale tiles:
            # well under 32 MiB on every generation (v5e default would be 16 MiB).
            vmem_limit_bytes=32 * 1024 * 1024,
        ),
        cost_estimate=cost,
    )(offset, scale, x)


if __name__ == "__main__":
    key = jax.random.PRNGKey(0)
    kx, ko, ks, kx2, ko2, ks2 = jax.random.split(key, 6)

    # Small shape consistent with the module: batch=16 rows, 128 features.
    N, F = 16, 128
    x = jax.random.normal(kx, (N, F), dtype=jnp.float32)
    offset = jax.random.normal(ko, (1, F), dtype=jnp.float32)
    scale = jax.random.uniform(ks, (1, F), dtype=jnp.float32, minval=0.5, maxval=2.0)

    out = jax.block_until_ready(scaler_forward(x, offset, scale))
    ref = (x - offset) * scale
    assert out.shape == x.shape and out.dtype == x.dtype
    assert jnp.allclose(out, ref, rtol=1e-6, atol=1e-6)

    # Second small check: N not divisible by the row tile -> exercises the
    # cdiv grid + masked edge-block path needed once tiles are large.
    N2, F2 = 40, 256
    x2 = jax.random.normal(kx2, (N2, F2), dtype=jnp.float32)
    off2 = jax.random.normal(ko2, (1, F2), dtype=jnp.float32)
    sc2 = jax.random.uniform(ks2, (1, F2), dtype=jnp.float32, minval=0.5, maxval=2.0)
    out2 = jax.block_until_ready(scaler_forward(x2, off2, sc2, tm=16, tf=128))
    assert jnp.allclose(out2, (x2 - off2) * sc2, rtol=1e-6, atol=1e-6)

    print("KERNEL_OK")
</pallas_src>

<mosaic_0001>
module attributes {stable_mosaic.version = 11 : i64} {
  func.func @_scaler_kernel(%arg0: i32, %arg1: i32, %arg2: memref<1x128xf32, #tpu.memory_space<vmem>>, %arg3: memref<1x128xf32, #tpu.memory_space<vmem>>, %arg4: memref<16x128xf32, #tpu.memory_space<vmem>>, %arg5: memref<16x128xf32, #tpu.memory_space<vmem>>) attributes {dimension_semantics = [#tpu.dimension_semantics<parallel>, #tpu.dimension_semantics<parallel>], iteration_bounds = array<i64: 1, 1>, scalar_prefetch = 0 : i64, scratch_operands = 0 : i64, tpu.core_type = #tpu.core_type<tc>, window_params = [{transform_indices = @transform_0, window_bounds = array<i64: 1, 128>}, {transform_indices = @transform_1, window_bounds = array<i64: 1, 128>}, {transform_indices = @transform_2, window_bounds = array<i64: 16, 128>}, {transform_indices = @transform_3, window_bounds = array<i64: 16, 128>}]} {
    %c0 = arith.constant 0 : index
    %c0_0 = arith.constant 0 : index
    %0 = vector.load %arg4[%c0, %c0_0] : memref<16x128xf32, #tpu.memory_space<vmem>>, vector<16x128xf32>
    %c0_1 = arith.constant 0 : index
    %c0_2 = arith.constant 0 : index
    %1 = vector.load %arg2[%c0_1, %c0_2] : memref<1x128xf32, #tpu.memory_space<vmem>>, vector<1x128xf32>
    %2 = vector.broadcast %1 : vector<1x128xf32> to vector<16x128xf32>
    %3 = arith.subf %0, %2 : vector<16x128xf32>
    %c0_3 = arith.constant 0 : index
    %c0_4 = arith.constant 0 : index
    %4 = vector.load %arg3[%c0_3, %c0_4] : memref<1x128xf32, #tpu.memory_space<vmem>>, vector<1x128xf32>
    %5 = vector.broadcast %4 : vector<1x128xf32> to vector<16x128xf32>
    %6 = arith.mulf %3, %5 : vector<16x128xf32>
    %c0_5 = arith.constant 0 : index
    %c0_6 = arith.constant 0 : index
    %7 = vector.load %arg5[%c0_5, %c0_6] : memref<16x128xf32, #tpu.memory_space<vmem>>, vector<16x128xf32>
    tpu.vector_store %arg5[%c0_5, %c0_6], %6 {strides = array<i32>} : memref<16x128xf32, #tpu.memory_space<vmem>>, vector<16x128xf32>,
    return
  }
  func.func @transform_0(%arg0: i32, %arg1: i32) -> (i32, i32) {
    %c0_i32 = arith.constant 0 : i32
    %c0_i32_0 = arith.constant 0 : i32
    return %c0_i32, %arg1 : i32, i32
  }
  func.func @transform_1(%arg0: i32, %arg1: i32) -> (i32, i32) {
    %c0_i32 = arith.constant 0 : i32
    %c0_i32_0 = arith.constant 0 : i32
    return %c0_i32, %arg1 : i32, i32
  }
  func.func @transform_2(%arg0: i32, %arg1: i32) -> (i32, i32) {
    %c0_i32 = arith.constant 0 : i32
    return %arg0, %arg1 : i32, i32
  }
  func.func @transform_3(%arg0: i32, %arg1: i32) -> (i32, i32) {
    %c0_i32 = arith.constant 0 : i32
    return %arg0, %arg1 : i32, i32
  }
}

</mosaic_0001>

<bundles_post_ra>
// kernel: tpu_custom_call.1
= control target key start
LH: loop header
LB: loop body
LE: loop exit
PB: predicated region body
PF: predicated region fallthrough
CT: control target
= control target key end

     0   :  { %8 = vsyncpa [#allocation3], 0  ;;  %s242_s0 = inlined_call_operand.hbm [shape: f32[1,128], index: 0, kind: input, shape index: {}]   ;;  %s243_s1 = inlined_call_operand.hbm [shape: f32[1,128], index: 1, kind: input, shape index: {}]   ;;  %s244_s2 = inlined_call_operand.hbm [shape: f32[16,128], index: 2, kind: input, shape index: {}]   ;;  %s245_s3 = inlined_call_operand.hbm [shape: f32[16,128], index: 3, kind: output, shape index: {}]  }
   0x1   :  { %9 = vsyncpa [#allocation6], 0  ;;  %s27_s14 = sshll.u32 %s243_s1, 4  ;;  %s28_s14 = int_to_ptr.hbm [resolvable:$true] %s27_s14 }
   0x2   :  { %10 = vsyncpa [#allocation4], 0  ;;  %s204_s15 = smov [#allocation5]   ;;  %s16_s19 = sshll.u32 %s242_s0, 4  ;;  %s17_s19 = int_to_ptr.hbm [resolvable:$true] %s16_s19 }
   0x3   :  { %s29_s16 = sshll.u32 %s204_s15, 4  ;;  %s205_s20 = smov [#allocation2]   ;;  %s30_s16 = int_to_ptr.vmem [resolvable:$true] %s29_s16 }
   0x4   :  { %32 = dma.hbm_to_vmem [thread:$0]  %s28_s14, 16, %s30_s16, [#allocation6]  }
   0x5   :  { %s18_s21 = sshll.u32 %s205_s20, 4  ;;  %s37_s24 = sshll.u32 %s244_s2, 4  ;;  %s19_s21 = int_to_ptr.vmem [resolvable:$true] %s18_s21  ;;  %s38_s24 = int_to_ptr.hbm [resolvable:$true] %s37_s24 }
   0x6   :  { %21 = dma.hbm_to_vmem [thread:$0]  %s17_s19, 16, %s19_s21, [#allocation3]  }
   0x7   :  { %s206_s1 = smov [#allocation7]   ;;  %s207_s26 = smov 128  }
   0x8   :  { %s39_s25 = sshll.u32 %s206_s1, 4  ;;  %s208_s27 = smov 8   ;;  %s40_s25 = int_to_ptr.vmem [resolvable:$true] %s39_s25 }
   0x9   :  { %45 = dma.hbm_to_vmem [thread:$0]  %s38_s24, 256, %s40_s25, [#allocation6], %s207_s26, %s207_s26, %s208_s27  }
   0xa   :  { %198 = dma.done.wait [#allocation3], 16  }
   0xb   :  { %199 = vsyncadd [#allocation3], 4294967280 }
   0xc   :  { %200 = dma.done.wait [#allocation6], 272  }
   0xd   :  { %201 = vsyncadd [#allocation6], 4294967024  ;;  %v58_v0 = vld [vmem:[#allocation7] sm:$0xff]  ;;  %v100_v1 = vld [vmem:[#allocation2] ss:$0 sm:$0xff]  ;;  %s209_s0 = smov [#allocation8]  }
   0xe   :  { %v101_v2 = vld [vmem:[#allocation5] ss:$0 sm:$0xff]  ;;  %v59_v3 = vld [vmem:[#allocation7 + $0x8] sm:$0xff]  ;;  %v64_v4 = vsub.f32 %v58_v0, %v100_v1  ;;  %s78_s2 = sshll.u32 %s209_s0, 4  ;;  %s80_s30 = sshll.u32 %s245_s3, 4  ;;  %s79_s2 = int_to_ptr.vmem [resolvable:$true] %s78_s2  ;;  %s81_s30 = int_to_ptr.hbm [resolvable:$true] %s80_s30 }
   0xf   :  { %v65_v5 = vsub.f32 %v59_v3, %v100_v1 }
  0x10   :  { %v70_v6 = vmul.f32 %v101_v2, %v64_v4 }
  0x11   :  { %v71_v7 = vmul.f32 %v101_v2, %v65_v5 }
  0x12   :  { %72 = vst [vmem:[#allocation8] sm:$0xff] %v70_v6 }
  0x13   :  { %73 = vst [vmem:[#allocation8 + $0x8] sm:$0xff] %v71_v7 }
  0x14   :  { %86 = dma.vmem_to_hbm [thread:$0]  %s79_s2, 256, %s81_s30, [#allocation4], %s207_s26, %s207_s26, %s208_s27  }
  0x15   :  { %202 = dma.done.wait [#allocation4], 256  }
  0x16   :  { %203 = vsyncadd [#allocation4], 4294967040 }
  0x17   :  { %91 = vsyncpa [#allocation3], 1 }
  0x18   :  { %92 = vsyncpa [#allocation6], 1 }
  0x19   :  { %93 = vsyncpa [#allocation4], 1 }

</bundles_post_ra>
